<compile_context>
chip_gen: v7x
topology: tpu7x:2x2x1
jax: 0.10.0
libtpu: 0.0.40
codegen_flags: <defaults>
</compile_context>

<pallas_src>
import math

import jax
import jax.numpy as jnp
from jax.experimental import pallas as pl
from jax.experimental.pallas import tpu as pltpu


# ---------------------------------------------------------------------------
# Pallas kernels: elementwise normalize / unnormalize on one (TB, L) tile.
# mean / scale are (1, L) resident blocks broadcast over the tile rows.
# ---------------------------------------------------------------------------
def _norm_kernel(x_ref, mean_ref, inv_ref, o_ref):
    # (data.float() - mean) * (1 / (std + eps))
    x = x_ref[...].astype(jnp.float32)
    o_ref[...] = ((x - mean_ref[...]) * inv_ref[...]).astype(o_ref.dtype)


def _unnorm_kernel(x_ref, mean_ref, scale_ref, o_ref):
    # data.float() * (std + eps) + mean
    x = x_ref[...].astype(jnp.float32)
    o_ref[...] = (x * scale_ref[...] + mean_ref[...]).astype(o_ref.dtype)


def _round_up(x, m):
    return ((x + m - 1) // m) * m


def _fold_layout(B, D):
    """Decide how to present [B, D] to the kernel with zero extra HBM copies.

    Returns (n_rows, lane_width, fold):
      fold == 1 : use x as-is ([B, lane_width == D]).
      fold  > 1 : reshape (free) to [B // fold, D * fold] and tile stats `fold`x.
    """
    if D % 128 == 0:
        return B, D, 1
    g = math.gcd(D, 128)
    fold = 128 // g
    L = D * fold                              # lcm(D, 128)
    if B >= fold and B % fold == 0 and L <= 4096:
        return B // fold, L, fold
    # Fallback: full-D block (not lane-dense -> masked stores) but no copies.
    return B, D, 1


def _choose_batch_tile(n_rows, lane, in_bytes, out_bytes, *,
                       target_tile_bytes=8 << 20, vmem_budget_bytes=24 << 20):
    """Batch-tile rows: big enough to amortize the ~0.35us per-grid-step cost,
    small enough that double-buffered in+out tiles stay within the VMEM budget."""
    row_in = lane * in_bytes
    row_vmem = 2 * lane * in_bytes + 2 * lane * out_bytes   # double-buffered in+out
    cap_vmem = max(1, vmem_budget_bytes // row_vmem)
    target_rows = max(1, target_tile_bytes // row_in)
    # sublane multiple: (8,128) f32 / (16,128) bf16 / (32,128) int8
    row_mult = max(8, 32 // max(1, min(in_bytes, out_bytes)))
    tb = min(cap_vmem, target_rows, _round_up(n_rows, row_mult))
    tb = max(row_mult, (tb // row_mult) * row_mult)
    return int(tb)


def running_norm_forward(data, mean, std, *, eps=1e-5, unnorm=False, out_dtype=None):
    """Pallas forward of RunningNorm.forward.

    data: (..., D) any float dtype (cast to f32 inside, matching torch `.float()`)
    mean, std: (D,) running statistics
    out_dtype: None -> float32 (torch semantics); pass data.dtype to halve writeback.
    """
    if out_dtype is None:
        out_dtype = jnp.float32

    orig_shape = data.shape
    D = orig_shape[-1]
    x2d = data.reshape(-1, D)
    B = x2d.shape[0]

    mean_f = mean.reshape(-1).astype(jnp.float32)
    std_f = std.reshape(-1).astype(jnp.float32)
    if unnorm:
        scale = std_f + eps                    # x * (std + eps) + mean
    else:
        scale = 1.0 / (std_f + eps)            # exact reciprocal once (~1 ulp vs divide)

    n_rows, lane, fold = _fold_layout(B, D)
    if fold > 1:
        x_k = x2d.reshape(n_rows, lane)        # contiguous reshape: no HBM copy
        mean_k = jnp.tile(mean_f, fold).reshape(1, lane)
        scale_k = jnp.tile(scale, fold).reshape(1, lane)
    else:
        x_k = x2d
        mean_k = mean_f.reshape(1, lane)
        scale_k = scale.reshape(1, lane)

    in_bytes = jnp.dtype(x_k.dtype).itemsize
    out_bytes = jnp.dtype(out_dtype).itemsize
    TB = _choose_batch_tile(n_rows, lane, in_bytes, out_bytes)
    grid = (pl.cdiv(n_rows, TB),)              # partial last block: OOB writes masked,
                                               # garbage OOB input rows harmless (elementwise)

    kernel = _unnorm_kernel if unnorm else _norm_kernel

    # Double-buffered input + output tiles plus the tiny resident (1, lane) stats.
    vmem_needed = 2 * TB * lane * (in_bytes + out_bytes) + 4 * lane * 4
    vmem_limit = int(min(max(vmem_needed + (4 << 20), 32 << 20), 40 << 20))

    cost = pl.CostEstimate(
        flops=2 * n_rows * lane,
        transcendentals=0,
        bytes_accessed=n_rows * lane * (in_bytes + out_bytes) + 2 * lane * 4,
    )

    # TODO(synk): on v7x, verify in the trace that the batch axis shards across
    # both TensorCores; if not, switch to pltpu.CORE_PARALLEL / pl.core_map.
    out = pl.pallas_call(
        kernel,
        out_shape=jax.ShapeDtypeStruct((n_rows, lane), out_dtype),
        grid=grid,
        in_specs=[
            pl.BlockSpec((TB, lane), lambda i: (i, 0)),   # streamed batch tiles
            pl.BlockSpec((1, lane), lambda i: (0, 0)),    # mean: resident
            pl.BlockSpec((1, lane), lambda i: (0, 0)),    # inv / scale: resident
        ],
        out_specs=pl.BlockSpec((TB, lane), lambda i: (i, 0)),
        compiler_params=pltpu.CompilerParams(
            dimension_semantics=("parallel",),
            vmem_limit_bytes=vmem_limit,
        ),
        cost_estimate=cost,
    )(x_k, mean_k, scale_k)

    return out.reshape(orig_shape[:-1] + (D,))


# ---------------------------------------------------------------------------
# Plain-JAX glue mirroring RunningNorm.__init__ and _update (state handling,
# not the hot path).
# ---------------------------------------------------------------------------
def running_norm_init(shape):
    return dict(
        mean=jnp.zeros(shape, jnp.float32),
        var=jnp.ones(shape, jnp.float32),
        count=jnp.zeros((1,), jnp.float32),
        std=jnp.ones(shape, jnp.float32),
    )


def running_norm_update(state, batch_mean, batch_var, batch_count):
    mean, var, count = state["mean"], state["var"], state["count"]
    delta = batch_mean - mean
    new_count = count + batch_count
    new_mean = mean + delta * (batch_count / new_count)
    new_var = count * var + batch_count * batch_var
    new_var = new_var + delta ** 2 * count * batch_count / new_count
    new_var = new_var / new_count
    return dict(mean=new_mean, var=new_var, count=new_count, std=jnp.sqrt(new_var))


if __name__ == "__main__":
    key = jax.random.PRNGKey(0)
    B, D = 8, 32
    eps = 1e-5

    kx, kb, k3, k4, k5 = jax.random.split(key, 5)
    x = jax.random.normal(kx, (B, D), dtype=jnp.float32) * 3.0 + 1.5

    # Deterministic init per RunningNorm.__init__ (zeros / ones), then one
    # update() with synthetic batch stats so the stats are non-trivial.
    state = running_norm_init((D,))
    batch = jax.random.normal(kb, (64, D), dtype=jnp.float32) * 2.0 - 0.5
    state = running_norm_update(
        state, jnp.mean(batch, axis=0), jnp.var(batch, axis=0), batch.shape[0]
    )

    # Fold path (D=32 -> lane 128): normalize, then unnormalize (round trip).
    y = running_norm_forward(x, state["mean"], state["std"], eps=eps, unnorm=False)
    x_back = running_norm_forward(y, state["mean"], state["std"], eps=eps, unnorm=True)
    jax.block_until_ready((y, x_back))

    y_ref = (x.astype(jnp.float32) - state["mean"]) / (state["std"] + eps)
    x_ref = y_ref.astype(jnp.float32) * (state["std"] + eps) + state["mean"]

    assert y.dtype == jnp.float32 and x_back.dtype == jnp.float32
    assert jnp.allclose(y, y_ref, atol=1e-5, rtol=1e-5)
    assert jnp.allclose(x_back, x_ref, atol=1e-5, rtol=1e-5)
    assert jnp.allclose(x_back, x, atol=1e-4, rtol=1e-4)

    # Leading-batch-dims input (broadcast path, like torch).
    x3 = jax.random.normal(k3, (2, 4, D), dtype=jnp.float32)
    y3 = running_norm_forward(x3, state["mean"], state["std"], eps=eps)
    y3_ref = (x3 - state["mean"]) / (state["std"] + eps)
    jax.block_until_ready(y3)
    assert jnp.allclose(y3, y3_ref, atol=1e-5, rtol=1e-5)

    # Direct path (D multiple of 128, partial last batch block).
    D4 = 128
    st4 = running_norm_init((D4,))
    b4 = jax.random.normal(k4, (32, D4), dtype=jnp.float32) * 1.7 + 0.3
    st4 = running_norm_update(st4, jnp.mean(b4, axis=0), jnp.var(b4, axis=0), b4.shape[0])
    x4 = jax.random.normal(k4, (10, D4), dtype=jnp.float32)
    y4 = running_norm_forward(x4, st4["mean"], st4["std"], eps=eps)
    y4_ref = (x4 - st4["mean"]) / (st4["std"] + eps)
    jax.block_until_ready(y4)
    assert jnp.allclose(y4, y4_ref, atol=1e-5, rtol=1e-5)

    # Fallback path (D not foldable, B not divisible): full-D block, no copies.
    D5, B5 = 33, 7
    st5 = running_norm_init((D5,))
    b5 = jax.random.normal(k5, (32, D5), dtype=jnp.float32) * 0.8 - 1.2
    st5 = running_norm_update(st5, jnp.mean(b5, axis=0), jnp.var(b5, axis=0), b5.shape[0])
    x5 = jax.random.normal(k5, (B5, D5), dtype=jnp.float32)
    y5 = running_norm_forward(x5, st5["mean"], st5["std"], eps=eps)
    y5_ref = (x5 - st5["mean"]) / (st5["std"] + eps)
    jax.block_until_ready(y5)
    assert jnp.allclose(y5, y5_ref, atol=1e-5, rtol=1e-5)

    print("KERNEL_OK")
</pallas_src>

<mosaic_0001>
module attributes {stable_mosaic.version = 11 : i64} {
  func.func @_norm_kernel(%arg0: i32, %arg1: memref<8x128xf32, #tpu.memory_space<vmem>>, %arg2: memref<1x128xf32, #tpu.memory_space<vmem>>, %arg3: memref<1x128xf32, #tpu.memory_space<vmem>>, %arg4: memref<8x128xf32, #tpu.memory_space<vmem>>) attributes {dimension_semantics = [#tpu.dimension_semantics<parallel>], iteration_bounds = array<i64: 1>, scalar_prefetch = 0 : i64, scratch_operands = 0 : i64, tpu.core_type = #tpu.core_type<tc>, window_params = [{transform_indices = @transform_0, window_bounds = array<i64: 8, 128>}, {pipeline_mode = #tpu.pipeline_mode<synchronous>, transform_indices = @transform_1, window_bounds = array<i64: 1, 128>}, {pipeline_mode = #tpu.pipeline_mode<synchronous>, transform_indices = @transform_2, window_bounds = array<i64: 1, 128>}, {transform_indices = @transform_3, window_bounds = array<i64: 8, 128>}]} {
    %c0 = arith.constant 0 : index
    %c0_0 = arith.constant 0 : index
    %0 = vector.load %arg1[%c0, %c0_0] : memref<8x128xf32, #tpu.memory_space<vmem>>, vector<8x128xf32>
    %c0_1 = arith.constant 0 : index
    %c0_2 = arith.constant 0 : index
    %1 = vector.load %arg2[%c0_1, %c0_2] : memref<1x128xf32, #tpu.memory_space<vmem>>, vector<1x128xf32>
    %2 = vector.broadcast %1 : vector<1x128xf32> to vector<8x128xf32>
    %3 = arith.subf %0, %2 : vector<8x128xf32>
    %c0_3 = arith.constant 0 : index
    %c0_4 = arith.constant 0 : index
    %4 = vector.load %arg3[%c0_3, %c0_4] : memref<1x128xf32, #tpu.memory_space<vmem>>, vector<1x128xf32>
    %5 = vector.broadcast %4 : vector<1x128xf32> to vector<8x128xf32>
    %6 = arith.mulf %3, %5 : vector<8x128xf32>
    %c0_5 = arith.constant 0 : index
    %c0_6 = arith.constant 0 : index
    %7 = vector.load %arg4[%c0_5, %c0_6] : memref<8x128xf32, #tpu.memory_space<vmem>>, vector<8x128xf32>
    tpu.vector_store %arg4[%c0_5, %c0_6], %6 {strides = array<i32>} : memref<8x128xf32, #tpu.memory_space<vmem>>, vector<8x128xf32>,
    return
  }
  func.func @transform_0(%arg0: i32) -> (i32, i32) {
    %c0_i32 = arith.constant 0 : i32
    %c0_i32_0 = arith.constant 0 : i32
    return %arg0, %c0_i32 : i32, i32
  }
  func.func @transform_1(%arg0: i32) -> (i32, i32) {
    %c0_i32 = arith.constant 0 : i32
    %c0_i32_0 = arith.constant 0 : i32
    %c0_i32_1 = arith.constant 0 : i32
    return %c0_i32, %c0_i32_0 : i32, i32
  }
  func.func @transform_2(%arg0: i32) -> (i32, i32) {
    %c0_i32 = arith.constant 0 : i32
    %c0_i32_0 = arith.constant 0 : i32
    %c0_i32_1 = arith.constant 0 : i32
    return %c0_i32, %c0_i32_0 : i32, i32
  }
  func.func @transform_3(%arg0: i32) -> (i32, i32) {
    %c0_i32 = arith.constant 0 : i32
    %c0_i32_0 = arith.constant 0 : i32
    return %arg0, %c0_i32 : i32, i32
  }
}

</mosaic_0001>

<bundles_post_ra>
// kernel: tpu_custom_call.1
= control target key start
LH: loop header
LB: loop body
LE: loop exit
PB: predicated region body
PF: predicated region fallthrough
CT: control target
= control target key end

     0   :  { %8 = vsyncpa [#allocation3], 0  ;;  %s178_s0 = inlined_call_operand.hbm [shape: f32[2,128], index: 0, kind: input, shape index: {}]   ;;  %s179_s1 = inlined_call_operand.vmem [shape: f32[1,128], index: 1, kind: input, shape index: {}]   ;;  %s180_s2 = inlined_call_operand.vmem [shape: f32[1,128], index: 2, kind: input, shape index: {}]   ;;  %s181_s3 = inlined_call_operand.hbm [shape: f32[2,128], index: 3, kind: output, shape index: {}]  }
   0x1   :  { %9 = vsyncpa [#allocation4], 0 }
   0x2   :  { %14 = vsyncadd [#allocation3], 96  ;;  %s118_s12 = smov [#allocation2]   ;;  %s70_s16 = scalar_lea.hbm %s178_s0, 32 }
   0x3   :  { %s15_s13 = sshll.u32 %s118_s12, 4  ;;  %p71_p0 = scmp.ne.s32.totalorder %s178_s0, %s70_s16  ;;  %s16_s13 = int_to_ptr.vmem [resolvable:$true] %s15_s13 }
   0x4   :  { %p74_p1 = scmp.lt.u32.totalorder %s70_s16, %s178_s0 }
   0x6   :  { %p76_p2 = pnand %p74_p1, %p71_p0 }
   0x8   :  { %79 = shalt.err (!%p76_p2)
}
   0x9   :  { %s80_s21 = scalar_lea.vmem %s16_s13, 32  ;;  %s84_s22 = scalar_lea.vmem %s16_s13, 128 }
   0xa   :  { %p81_p3 = scmp.ne.s32.totalorder %s16_s13, %s80_s21  ;;  %p85_p4 = scmp.lt.s32.totalorder %s16_s13, %s16_s13 }
   0xb   :  { %p86_p5 = scmp.lt.s32.totalorder %s84_s22, %s80_s21 }
   0xd   :  { %p87_p6 = por %p86_p5, %p85_p4 }
   0xf   :  { %p88_p7 = pnand %p87_p6, %p81_p3 }
  0x11   :  { %91 = shalt.err (!%p88_p7)
}
  0x12   :  { %s119_s23 = smov 32   ;;  %s120_s24 = smov 2  }
  0x13   :  { %21 = dma.hbm_to_vmem [thread:$0]  %s178_s0, 32, %s16_s13, [#allocation3], %s119_s23, %s119_s23, %s120_s24  }
  0x14   :  { %114 = dma.done.wait [#allocation3], 128  }
  0x15   :  { %115 = vsyncadd [#allocation3], 4294967168  ;;  %v29_v0 = vld [vmem:[#allocation2] sm:$0xff] }
  0x16   :  { %v64_v1 = vld [vmem:[%s179_s1] ss:$0 sm:$0xff] }
  0x17   :  { %v65_v2 = vld [vmem:[%s180_s2] ss:$0 sm:$0xff]  ;;  %v37_v3 = vsub.f32 %v29_v0, %v64_v1 }
  0x19   :  { %v45_v4 = vmul.f32 %v65_v2, %v37_v3 }
  0x1b   :  { %46 = vst [vmem:[#allocation5] sm:$0xff] %v45_v4 }
  0x1c   :  { %51 = vsyncadd [#allocation4], 96  ;;  %s121_s4 = smov [#allocation5]  }
  0x1d   :  { %s52_s5 = sshll.u32 %s121_s4, 4  ;;  %s53_s5 = int_to_ptr.vmem [resolvable:$true] %s52_s5 }
  0x1e   :  { %s92_s6 = scalar_lea.vmem %s53_s5, 32  ;;  %s96_s0 = scalar_lea.vmem %s53_s5, 128 }
  0x1f   :  { %p93_p8 = scmp.ne.s32.totalorder %s53_s5, %s92_s6  ;;  %p97_p9 = scmp.lt.s32.totalorder %s53_s5, %s53_s5 }
  0x20   :  { %p98_p10 = scmp.lt.s32.totalorder %s96_s0, %s92_s6 }
  0x22   :  { %p99_p11 = por %p98_p10, %p97_p9 }
  0x24   :  { %p100_p12 = pnand %p99_p11, %p93_p8 }
  0x26   :  { %103 = shalt.err (!%p100_p12)
}
  0x27   :  { %s104_s8 = scalar_lea.hbm %s181_s3, 32 }
  0x28   :  { %p105_p13 = scmp.ne.s32.totalorder %s181_s3, %s104_s8  ;;  %p108_p0 = scmp.lt.u32.totalorder %s104_s8, %s181_s3 }
  0x2a   :  { %p110_p1 = pnand %p108_p0, %p105_p13 }
  0x2c   :  { %113 = shalt.err (!%p110_p1)
}
  0x2d   :  { %58 = dma.vmem_to_hbm [thread:$0]  %s53_s5, 32, %s181_s3, [#allocation4], %s119_s23, %s119_s23, %s120_s24  }
  0x2e   :  { %116 = dma.done.wait [#allocation4], 128  }
  0x2f   :  { %117 = vsyncadd [#allocation4], 4294967168 }
  0x30   :  { %62 = vsyncpa [#allocation3], 1 }
  0x31   :  { %63 = vsyncpa [#allocation4], 1 }

</bundles_post_ra>
